<compile_context>
chip_gen: v5e
topology: v5e:2x2
jax: 0.10.0
libtpu: 0.0.40
codegen_flags: <defaults>
</compile_context>

<pallas_src>
import jax
import jax.numpy as jnp
from jax import lax
from jax.experimental import pallas as pl
from jax.experimental.pallas import tpu as pltpu


# --------------------------------------------------------------------------
# CLIP contrastive loss kernel (tiled over image rows, reductions in scratch)
# --------------------------------------------------------------------------
def _clip_loss_kernel(scale_ref, img_ref, txt_ref, loss_ref,
                      col_m, col_l, row_acc, diag_acc):
    i = pl.program_id(0)
    n_row_tiles = pl.num_programs(0)
    tm = img_ref.shape[0]

    @pl.when(i == 0)
    def _init():
        col_m[...] = jnp.full(col_m.shape, -jnp.inf, jnp.float32)
        col_l[...] = jnp.zeros(col_l.shape, jnp.float32)
        row_acc[...] = jnp.zeros(row_acc.shape, jnp.float32)
        diag_acc[...] = jnp.zeros(diag_acc.shape, jnp.float32)

    scale = scale_ref[0]                  # f32 scalar (SMEM)
    img = img_ref[...]                    # (TM, D) native-dtype (bf16) image tile
    txt = txt_ref[...]                    # (N, D) resident text matrix

    # logits tile = scale * img_tile @ txt^T : contract last dims of both operands
    # (no transpose), bf16 operands on the MXU, f32 accumulation.  The f32 scale is
    # applied to the f32 logits tile (avoids rounding the temperature to bf16).
    s = scale * lax.dot_general(img, txt, (((1,), (1,)), ((), ())),
                                preferred_element_type=jnp.float32)   # (TM, N) f32

    # ---- image -> text direction: exact per-row logsumexp (full row present) ----
    row_max = jnp.max(s, axis=1, keepdims=True)                                # (TM, 1)
    row_lse = row_max + jnp.log(jnp.sum(jnp.exp(s - row_max), axis=1,
                                        keepdims=True))                        # (TM, 1)
    row_acc[...] = row_acc[...] + jnp.sum(row_lse)

    # ---- diagonal term: slice matching text rows out of the resident block ----
    # (free VMEM load, no extra DMA input); elementwise dot in f32, scaled in f32.
    row0 = pl.multiple_of(i * tm, tm)
    txt_diag = txt_ref[pl.ds(row0, tm), :]                                     # (TM, D)
    diag_acc[...] = diag_acc[...] + scale * jnp.sum(
        img.astype(jnp.float32) * txt_diag.astype(jnp.float32))

    # ---- text -> image direction: online column max / rescaled exp-sum ----
    # Column sum is a sublane reduce (VALU/XLU) — keeps the MXU free for the main matmul.
    m_prev = col_m[...]                                                        # (1, N)
    m_new = jnp.maximum(m_prev, jnp.max(s, axis=0, keepdims=True))             # (1, N)
    p = jnp.exp(s - m_new)                                                     # (TM, N)
    col_l[...] = jnp.exp(m_prev - m_new) * col_l[...] + jnp.sum(p, axis=0,
                                                                keepdims=True)
    col_m[...] = m_new

    @pl.when(i == n_row_tiles - 1)
    def _finalize():
        n = float(col_m.shape[1])
        col_lse_sum = jnp.sum(col_m[...] + jnp.log(col_l[...]))
        loss_ref[...] = 0.5 * (row_acc[...] + col_lse_sum
                               - 2.0 * diag_acc[...]) / n                      # (1, 1)


def _vmem_capacity_bytes():
    try:
        return int(pltpu.get_tpu_info().vmem_capacity_bytes)
    except Exception:
        return 64 * 1024 * 1024   # conservative (v7x-sized) fallback


def _working_set_bytes(n, d, tm, feat_bytes):
    # resident text (single copy) + double-buffered image tiles
    # + ~3 (TM, N) f32 temporaries (logits / exp / diffs) + (1, N) column state + slack
    return (n * d * feat_bytes
            + 2 * tm * d * feat_bytes
            + 3 * tm * n * 4
            + 2 * n * 4
            + (1 << 20))


def _pick_row_tile(n, d, feat_bytes, budget_bytes):
    candidates = [t for t in (512, 256, 128, 64, 32, 16, 8) if n % t == 0] or [n]
    for tm in candidates:
        if _working_set_bytes(n, d, tm, feat_bytes) <= budget_bytes:
            return tm
    # TODO(synk): column-tile the text (2-D grid with online softmax in BOTH directions)
    # when the resident-text working set exceeds the VMEM budget (large global batches
    # on v7x); for now fall back to the smallest row tile.
    return candidates[-1]


def clip_contrastive_loss(image_features, text_features, logit_scale, *,
                          block_rows=None, compute_dtype=jnp.bfloat16):
    """Pallas-backed ClipLoss.forward (world_size == 1)."""
    n, d = image_features.shape
    assert text_features.shape == (n, d)

    if compute_dtype is not None and image_features.dtype != compute_dtype:
        # bf16 operands for the MXU (f32 accumulation inside the kernel); halves the
        # resident text footprint and HBM traffic.  logit_scale stays f32.
        image_features = image_features.astype(compute_dtype)
        text_features = text_features.astype(compute_dtype)
    feat_bytes = jnp.dtype(image_features.dtype).itemsize

    cap = _vmem_capacity_bytes()
    budget = int(cap * 0.75)   # ~48 MiB on v7x (64 MiB VMEM), ~96 MiB on v5e/v6e (128 MiB)

    tm = block_rows if block_rows is not None else _pick_row_tile(n, d, feat_bytes, budget)
    assert n % tm == 0, (n, tm)
    grid = (n // tm,)

    ws = _working_set_bytes(n, d, tm, feat_bytes)
    vmem_limit = int(max(32 << 20, min(budget, 2 * ws)))

    scale = jnp.asarray(logit_scale, jnp.float32).reshape((1,))

    out = pl.pallas_call(
        _clip_loss_kernel,
        out_shape=jax.ShapeDtypeStruct((1, 1), jnp.float32),
        grid_spec=pltpu.PrefetchScalarGridSpec(
            num_scalar_prefetch=0,
            grid=grid,
            in_specs=[
                pl.BlockSpec(memory_space=pltpu.MemorySpace.SMEM),   # logit_scale (f32)
                pl.BlockSpec((tm, d), lambda i: (i, 0)),             # image row tile (pipelined)
                pl.BlockSpec(memory_space=pltpu.MemorySpace.VMEM),   # full text, single VMEM copy
            ],
            out_specs=pl.BlockSpec((1, 1), lambda i: (0, 0)),
            scratch_shapes=[
                pltpu.VMEM((1, n), jnp.float32),     # running column max
                pltpu.VMEM((1, n), jnp.float32),     # running column exp-sum
                pltpu.VMEM((1, 1), jnp.float32),     # sum of row LSEs
                pltpu.VMEM((1, 1), jnp.float32),     # sum of diagonal logits
            ],
        ),
        compiler_params=pltpu.CompilerParams(
            # Scratch is carried across row tiles -> "arbitrary".
            # TODO(synk): v7x dual-TensorCore split (leading parallel axis with per-core
            # (m, l, row, diag) partials merged in a tiny epilogue) is not implemented.
            dimension_semantics=("arbitrary",),
            vmem_limit_bytes=vmem_limit,
        ),
    )(scale, image_features, text_features)
    return out[0, 0]


# --------------------------------------------------------------------------
# CCLoss: tiny O(B*K*D) elementwise reduce — plain jnp (perf review: a dedicated
# pallas_call only adds kernel-launch / DMA fixed overhead that XLA fusion avoids).
# --------------------------------------------------------------------------
def cc_loss(visual_concepts, textual_concepts):
    vc = jnp.asarray(visual_concepts)
    tc = jnp.asarray(textual_concepts).astype(jnp.float32)
    loss = -jnp.mean(jnp.einsum("bkd,bkd->bk", vc[0].astype(jnp.float32), tc))
    loss = loss + jnp.mean(jnp.einsum("bkd,bkd->bk", vc[1].astype(jnp.float32), tc))
    return loss


# --------------------------------------------------------------------------
# ComboLoss module
# --------------------------------------------------------------------------
class ComboLoss:
    """JAX/Pallas port of open_clip ComboLoss (single-process, world_size == 1)."""

    def __init__(self, local_loss=False, gather_with_grad=False, cache_labels=False,
                 rank=0, world_size=1, use_horovod=False, allow_bootstrap=True):
        # TODO(synk): world_size > 1 gather_features / local_loss offsets / mask need
        # a torch.distributed-style all_gather; only the world_size == 1 path is here.
        assert world_size == 1, "only the single-process path is implemented"
        self.allow_bootstrap = allow_bootstrap

    def __call__(self, visual_concepts, textual_concepts, topk_indices,
                 concepts_embeddings_normed, image_features, text_features,
                 logit_scale, output_dict=False):
        del topk_indices, concepts_embeddings_normed   # unused by the reference forward
        cliploss = clip_contrastive_loss(image_features, text_features, logit_scale)
        if self.allow_bootstrap:
            ccloss = cc_loss(visual_concepts, textual_concepts)
        else:
            ccloss = jnp.float32(0.0)
        if output_dict:
            return {"cliploss": cliploss, "ccloss": ccloss}
        return cliploss + ccloss


# --------------------------- pure-JAX references ---------------------------
def _ref_clip_loss(img, txt, scale, compute_dtype=jnp.bfloat16):
    if compute_dtype is not None:
        img = img.astype(compute_dtype)
        txt = txt.astype(compute_dtype)
    logits = jnp.float32(scale) * jnp.dot(img, txt.T,
                                          preferred_element_type=jnp.float32,
                                          precision=lax.Precision.HIGHEST)
    n = logits.shape[0]
    idx = jnp.arange(n)

    def ce(l):
        return jnp.mean(jax.nn.logsumexp(l, axis=1) - l[idx, idx])

    return 0.5 * (ce(logits) + ce(logits.T))


def _ref_cc_loss(vc, tc):
    loss = -jnp.mean(jnp.einsum("bkd,bkd->bk", vc[0].astype(jnp.float32),
                                tc.astype(jnp.float32)))
    loss = loss + jnp.mean(jnp.einsum("bkd,bkd->bk", vc[1].astype(jnp.float32),
                                      tc.astype(jnp.float32)))
    return loss


if __name__ == "__main__":
    key = jax.random.PRNGKey(0)
    B, D, K, C = 24, 32, 4, 16   # batch, embed dim, concepts per sample, n concept rows
    k1, k2, k3, k4, k5 = jax.random.split(key, 5)

    def l2n(x):
        return x / jnp.linalg.norm(x, axis=-1, keepdims=True)

    image_features = l2n(jax.random.normal(k1, (B, D), jnp.float32))
    text_features = l2n(jax.random.normal(k2, (B, D), jnp.float32))
    visual_concepts = l2n(jax.random.normal(k3, (2, B, K, D), jnp.float32))
    textual_concepts = l2n(jax.random.normal(k4, (B, K, D), jnp.float32))
    concepts_embeddings_normed = l2n(jax.random.normal(k5, (C, D), jnp.float32))
    topk_indices = jnp.zeros((B, K), jnp.int32)
    logit_scale = jnp.float32(1.0 / 0.07)     # == exp(log(1/0.07)) as in CLIP

    loss_mod = ComboLoss(allow_bootstrap=True)

    # Default (bf16-MXU) path vs a reference that applies the same bf16 quantization.
    total = loss_mod(visual_concepts, textual_concepts, topk_indices,
                     concepts_embeddings_normed, image_features, text_features,
                     logit_scale)
    total = jax.block_until_ready(total)
    ref_bf16 = (_ref_clip_loss(image_features, text_features, logit_scale,
                               compute_dtype=jnp.bfloat16)
                + _ref_cc_loss(visual_concepts, textual_concepts))
    assert jnp.allclose(total, ref_bf16, rtol=1e-3, atol=1e-3), (total, ref_bf16)

    # Full-f32 path sanity check (loose tolerance: XLA / Mosaic f32 matmul precision
    # modes may differ slightly).
    clip_f32 = jax.block_until_ready(
        clip_contrastive_loss(image_features, text_features, logit_scale,
                              compute_dtype=None))
    ref_f32 = _ref_clip_loss(image_features, text_features, logit_scale,
                             compute_dtype=None)
    assert jnp.allclose(clip_f32, ref_f32, rtol=1e-2, atol=1e-2), (clip_f32, ref_f32)

    # output_dict path.
    parts = loss_mod(visual_concepts, textual_concepts, topk_indices,
                     concepts_embeddings_normed, image_features, text_features,
                     logit_scale, output_dict=True)
    parts_sum = jax.block_until_ready(parts["cliploss"] + parts["ccloss"])
    assert jnp.allclose(parts_sum, ref_bf16, rtol=1e-3, atol=1e-3), (parts_sum, ref_bf16)

    print("KERNEL_OK")
</pallas_src>

<mosaic_0001>
module attributes {stable_mosaic.version = 11 : i64} {
  func.func @_clip_loss_kernel(%arg0: i32, %arg1: memref<1xf32, #tpu.memory_space<smem>>, %arg2: memref<8x32xbf16, #tpu.memory_space<vmem>>, %arg3: memref<24x32xbf16, #tpu.memory_space<vmem>>, %arg4: memref<1x1xf32, #tpu.memory_space<vmem>>, %arg5: memref<1x24xf32, #tpu.memory_space<vmem>>, %arg6: memref<1x24xf32, #tpu.memory_space<vmem>>, %arg7: memref<1x1xf32, #tpu.memory_space<vmem>>, %arg8: memref<1x1xf32, #tpu.memory_space<vmem>>) attributes {dimension_semantics = [#tpu.dimension_semantics<arbitrary>], iteration_bounds = array<i64: 3>, scalar_prefetch = 0 : i64, scratch_operands = 4 : i64, tpu.core_type = #tpu.core_type<tc>, window_params = [{transform_indices = @transform_0, window_bounds = array<i64: 1>}, {transform_indices = @transform_1, window_bounds = array<i64: 8, 32>}, {pipeline_mode = #tpu.pipeline_mode<synchronous>, transform_indices = @transform_2, window_bounds = array<i64: 24, 32>}, {pipeline_mode = #tpu.pipeline_mode<synchronous>, transform_indices = @transform_3, window_bounds = array<i64: 1, 1>}]} {
    %c0_i32 = arith.constant 0 : i32
    %0 = arith.cmpi eq, %arg0, %c0_i32 : i32
    %1 = arith.extui %0 : i1 to i32
    %c0_i32_0 = arith.constant 0 : i32
    %2 = arith.cmpi ne, %1, %c0_i32_0 : i32
    scf.if %2 {
      %cst_29 = arith.constant 0xFF800000 : f32
      %61 = vector.broadcast %cst_29 : f32 to vector<1x24xf32>
      %c0_30 = arith.constant 0 : index
      %c0_31 = arith.constant 0 : index
      %62 = vector.load %arg5[%c0_30, %c0_31] : memref<1x24xf32, #tpu.memory_space<vmem>>, vector<1x24xf32>
      tpu.vector_store %arg5[%c0_30, %c0_31], %61 {strides = array<i32>} : memref<1x24xf32, #tpu.memory_space<vmem>>, vector<1x24xf32>,
      %cst_32 = arith.constant 0.000000e+00 : f32
      %63 = vector.broadcast %cst_32 : f32 to vector<1x24xf32>
      %c0_33 = arith.constant 0 : index
      %c0_34 = arith.constant 0 : index
      %64 = vector.load %arg6[%c0_33, %c0_34] : memref<1x24xf32, #tpu.memory_space<vmem>>, vector<1x24xf32>
      tpu.vector_store %arg6[%c0_33, %c0_34], %63 {strides = array<i32>} : memref<1x24xf32, #tpu.memory_space<vmem>>, vector<1x24xf32>,
      %cst_35 = arith.constant 0.000000e+00 : f32
      %65 = vector.broadcast %cst_35 : f32 to vector<1x1xf32>
      %c0_36 = arith.constant 0 : index
      %c0_37 = arith.constant 0 : index
      %66 = vector.load %arg7[%c0_36, %c0_37] : memref<1x1xf32, #tpu.memory_space<vmem>>, vector<1x1xf32>
      tpu.vector_store %arg7[%c0_36, %c0_37], %65 {strides = array<i32>} : memref<1x1xf32, #tpu.memory_space<vmem>>, vector<1x1xf32>,
      %cst_38 = arith.constant 0.000000e+00 : f32
      %67 = vector.broadcast %cst_38 : f32 to vector<1x1xf32>
      %c0_39 = arith.constant 0 : index
      %c0_40 = arith.constant 0 : index
      %68 = vector.load %arg8[%c0_39, %c0_40] : memref<1x1xf32, #tpu.memory_space<vmem>>, vector<1x1xf32>
      tpu.vector_store %arg8[%c0_39, %c0_40], %67 {strides = array<i32>} : memref<1x1xf32, #tpu.memory_space<vmem>>, vector<1x1xf32>,
    } else {
    }
    %c0 = arith.constant 0 : index
    %3 = memref.load %arg1[%c0] : memref<1xf32, #tpu.memory_space<smem>>
    %c0_1 = arith.constant 0 : index
    %c0_2 = arith.constant 0 : index
    %4 = vector.load %arg2[%c0_1, %c0_2] : memref<8x32xbf16, #tpu.memory_space<vmem>>, vector<8x32xbf16>
    %c0_3 = arith.constant 0 : index
    %c0_4 = arith.constant 0 : index
    %5 = vector.load %arg3[%c0_3, %c0_4] : memref<24x32xbf16, #tpu.memory_space<vmem>>, vector<24x32xbf16>
    %cst = arith.constant dense<0.000000e+00> : vector<8x24xf32>
    %6 = tpu.matmul %4, %5, %cst {dimension_numbers = #tpu.dot_dimension_numbers<[1], [1], [0], [0], [0, 0, 1, 0], [], []>} : vector<8x32xbf16>, vector<24x32xbf16>, vector<8x24xf32> -> vector<8x24xf32>
    %7 = vector.broadcast %3 : f32 to vector<8x24xf32>
    %8 = arith.mulf %7, %6 : vector<8x24xf32>
    %cst_5 = arith.constant dense<0xFF800000> : vector<8xf32>
    %9 = vector.multi_reduction <maximumf>, %8, %cst_5 [1] : vector<8x24xf32> to vector<8xf32>
    %10 = vector.shape_cast %9 : vector<8xf32> to vector<8x1xf32>
    %11 = vector.broadcast %10 : vector<8x1xf32> to vector<8x24xf32>
    %12 = arith.subf %8, %11 : vector<8x24xf32>
    %13 = math.exp %12 : vector<8x24xf32>
    %cst_6 = arith.constant dense<0.000000e+00> : vector<8xf32>
    %14 = vector.multi_reduction <add>, %13, %cst_6 [1] : vector<8x24xf32> to vector<8xf32>
    %15 = vector.shape_cast %14 : vector<8xf32> to vector<8x1xf32>
    %16 = math.log %15 : vector<8x1xf32>
    %17 = arith.addf %10, %16 : vector<8x1xf32>
    %c0_7 = arith.constant 0 : index
    %c0_8 = arith.constant 0 : index
    %18 = vector.load %arg7[%c0_7, %c0_8] : memref<1x1xf32, #tpu.memory_space<vmem>>, vector<1x1xf32>
    %19 = vector.shape_cast %17 : vector<8x1xf32> to vector<1x8x1xf32>
    %cst_9 = arith.constant dense<0.000000e+00> : vector<1xf32>
    %20 = vector.multi_reduction <add>, %19, %cst_9 [1, 2] : vector<1x8x1xf32> to vector<1xf32>
    %21 = vector.shape_cast %20 : vector<1xf32> to vector<1x1x1xf32>
    %22 = vector.extract %21[0, 0, 0] : f32 from vector<1x1x1xf32>
    %23 = vector.broadcast %22 : f32 to vector<1x1xf32>
    %24 = arith.addf %18, %23 : vector<1x1xf32>
    %c0_10 = arith.constant 0 : index
    %c0_11 = arith.constant 0 : index
    %25 = vector.load %arg7[%c0_10, %c0_11] : memref<1x1xf32, #tpu.memory_space<vmem>>, vector<1x1xf32>
    tpu.vector_store %arg7[%c0_10, %c0_11], %24 {strides = array<i32>} : memref<1x1xf32, #tpu.memory_space<vmem>>, vector<1x1xf32>,
    %c8_i32 = arith.constant 8 : i32
    %26 = arith.muli %arg0, %c8_i32 : i32
    %27 = tpu.assume_multiple %26, 8 : i32
    %28 = arith.index_cast %27 : i32 to index
    %c0_12 = arith.constant 0 : index
    %29 = vector.load %arg3[%28, %c0_12] : memref<24x32xbf16, #tpu.memory_space<vmem>>, vector<8x32xbf16>
    %c0_13 = arith.constant 0 : index
    %c0_14 = arith.constant 0 : index
    %30 = vector.load %arg8[%c0_13, %c0_14] : memref<1x1xf32, #tpu.memory_space<vmem>>, vector<1x1xf32>
    %31 = arith.extf %4 : vector<8x32xbf16> to vector<8x32xf32>
    %32 = arith.extf %29 : vector<8x32xbf16> to vector<8x32xf32>
    %33 = arith.mulf %31, %32 : vector<8x32xf32>
    %34 = vector.shape_cast %33 : vector<8x32xf32> to vector<1x8x32xf32>
    %cst_15 = arith.constant dense<0.000000e+00> : vector<1xf32>
    %35 = vector.multi_reduction <add>, %34, %cst_15 [1, 2] : vector<1x8x32xf32> to vector<1xf32>
    %36 = vector.shape_cast %35 : vector<1xf32> to vector<1x1x1xf32>
    %37 = vector.extract %36[0, 0, 0] : f32 from vector<1x1x1xf32>
    %38 = arith.mulf %3, %37 : f32
    %39 = vector.broadcast %38 : f32 to vector<1x1xf32>
    %40 = arith.addf %30, %39 : vector<1x1xf32>
    %c0_16 = arith.constant 0 : index
    %c0_17 = arith.constant 0 : index
    %41 = vector.load %arg8[%c0_16, %c0_17] : memref<1x1xf32, #tpu.memory_space<vmem>>, vector<1x1xf32>
    tpu.vector_store %arg8[%c0_16, %c0_17], %40 {strides = array<i32>} : memref<1x1xf32, #tpu.memory_space<vmem>>, vector<1x1xf32>,
    %c0_18 = arith.constant 0 : index
    %c0_19 = arith.constant 0 : index
    %42 = vector.load %arg5[%c0_18, %c0_19] : memref<1x24xf32, #tpu.memory_space<vmem>>, vector<1x24xf32>
    %cst_20 = arith.constant dense<0xFF800000> : vector<24xf32>
    %43 = vector.multi_reduction <maximumf>, %8, %cst_20 [0] : vector<8x24xf32> to vector<24xf32>
    %44 = vector.shape_cast %43 : vector<24xf32> to vector<1x24xf32>
    %45 = arith.maximumf %42, %44 : vector<1x24xf32>
    %46 = vector.broadcast %45 : vector<1x24xf32> to vector<8x24xf32>
    %47 = arith.subf %8, %46 : vector<8x24xf32>
    %48 = math.exp %47 : vector<8x24xf32>
    %49 = arith.subf %42, %45 : vector<1x24xf32>
    %50 = math.exp %49 : vector<1x24xf32>
    %c0_21 = arith.constant 0 : index
    %c0_22 = arith.constant 0 : index
    %51 = vector.load %arg6[%c0_21, %c0_22] : memref<1x24xf32, #tpu.memory_space<vmem>>, vector<1x24xf32>
    %52 = arith.mulf %50, %51 : vector<1x24xf32>
    %cst_23 = arith.constant dense<0.000000e+00> : vector<24xf32>
    %53 = vector.multi_reduction <add>, %48, %cst_23 [0] : vector<8x24xf32> to vector<24xf32>
    %54 = vector.shape_cast %53 : vector<24xf32> to vector<1x24xf32>
    %55 = arith.addf %52, %54 : vector<1x24xf32>
    %c0_24 = arith.constant 0 : index
    %c0_25 = arith.constant 0 : index
    %56 = vector.load %arg6[%c0_24, %c0_25] : memref<1x24xf32, #tpu.memory_space<vmem>>, vector<1x24xf32>
    tpu.vector_store %arg6[%c0_24, %c0_25], %55 {strides = array<i32>} : memref<1x24xf32, #tpu.memory_space<vmem>>, vector<1x24xf32>,
    %c0_26 = arith.constant 0 : index
    %c0_27 = arith.constant 0 : index
    %57 = vector.load %arg5[%c0_26, %c0_27] : memref<1x24xf32, #tpu.memory_space<vmem>>, vector<1x24xf32>
    tpu.vector_store %arg5[%c0_26, %c0_27], %45 {strides = array<i32>} : memref<1x24xf32, #tpu.memory_space<vmem>>, vector<1x24xf32>,
    %c2_i32 = arith.constant 2 : i32
    %58 = arith.cmpi eq, %arg0, %c2_i32 : i32
    %59 = arith.extui %58 : i1 to i32
    %c0_i32_28 = arith.constant 0 : i32
    %60 = arith.cmpi ne, %59, %c0_i32_28 : i32
    scf.if %60 {
      %c0_29 = arith.constant 0 : index
      %c0_30 = arith.constant 0 : index
      %61 = vector.load %arg5[%c0_29, %c0_30] : memref<1x24xf32, #tpu.memory_space<vmem>>, vector<1x24xf32>
      %c0_31 = arith.constant 0 : index
      %c0_32 = arith.constant 0 : index
      %62 = vector.load %arg6[%c0_31, %c0_32] : memref<1x24xf32, #tpu.memory_space<vmem>>, vector<1x24xf32>
      %63 = math.log %62 : vector<1x24xf32>
      %64 = arith.addf %61, %63 : vector<1x24xf32>
      %65 = vector.shape_cast %64 : vector<1x24xf32> to vector<1x1x24xf32>
      %cst_33 = arith.constant dense<0.000000e+00> : vector<1xf32>
      %66 = vector.multi_reduction <add>, %65, %cst_33 [1, 2] : vector<1x1x24xf32> to vector<1xf32>
      %67 = vector.shape_cast %66 : vector<1xf32> to vector<1x1x1xf32>
      %68 = vector.extract %67[0, 0, 0] : f32 from vector<1x1x1xf32>
      %c0_34 = arith.constant 0 : index
      %c0_35 = arith.constant 0 : index
      %69 = vector.load %arg7[%c0_34, %c0_35] : memref<1x1xf32, #tpu.memory_space<vmem>>, vector<1x1xf32>
      %70 = vector.broadcast %68 : f32 to vector<1x1xf32>
      %71 = arith.addf %69, %70 : vector<1x1xf32>
      %c0_36 = arith.constant 0 : index
      %c0_37 = arith.constant 0 : index
      %72 = vector.load %arg8[%c0_36, %c0_37] : memref<1x1xf32, #tpu.memory_space<vmem>>, vector<1x1xf32>
      %cst_38 = arith.constant 2.000000e+00 : f32
      %73 = vector.broadcast %cst_38 : f32 to vector<1x1xf32>
      %74 = arith.mulf %73, %72 : vector<1x1xf32>
      %75 = arith.subf %71, %74 : vector<1x1xf32>
      %cst_39 = arith.constant 5.000000e-01 : f32
      %76 = vector.broadcast %cst_39 : f32 to vector<1x1xf32>
      %77 = arith.mulf %76, %75 : vector<1x1xf32>
      %cst_40 = arith.constant 2.400000e+01 : f32
      %78 = vector.broadcast %cst_40 : f32 to vector<1x1xf32>
      %79 = arith.divf %77, %78 : vector<1x1xf32>
      %c0_41 = arith.constant 0 : index
      %c0_42 = arith.constant 0 : index
      %80 = vector.load %arg4[%c0_41, %c0_42] : memref<1x1xf32, #tpu.memory_space<vmem>>, vector<1x1xf32>
      tpu.vector_store %arg4[%c0_41, %c0_42], %79 {strides = array<i32>} : memref<1x1xf32, #tpu.memory_space<vmem>>, vector<1x1xf32>,
    } else {
    }
    return
  }
  func.func @transform_0(%arg0: i32) -> i32 {
    %c0_i32 = arith.constant 0 : i32
    %c0_i32_0 = arith.constant 0 : i32
    return %c0_i32 : i32
  }
  func.func @transform_1(%arg0: i32) -> (i32, i32) {
    %c0_i32 = arith.constant 0 : i32
    %c0_i32_0 = arith.constant 0 : i32
    return %arg0, %c0_i32 : i32, i32
  }
  func.func @transform_2(%arg0: i32) -> (i32, i32) {
    %c0_i32 = arith.constant 0 : i32
    %c0_i32_0 = arith.constant 0 : i32
    %c0_i32_1 = arith.constant 0 : i32
    return %c0_i32, %c0_i32_0 : i32, i32
  }
  func.func @transform_3(%arg0: i32) -> (i32, i32) {
    %c0_i32 = arith.constant 0 : i32
    %c0_i32_0 = arith.constant 0 : i32
    %c0_i32_1 = arith.constant 0 : i32
    return %c0_i32, %c0_i32_0 : i32, i32
  }
}

</mosaic_0001>

<bundles_post_ra>
// kernel: tpu_custom_call.1
= control target key start
LH: loop header
LB: loop body
LE: loop exit
PB: predicated region body
PF: predicated region fallthrough
CT: control target
= control target key end

     0   :  { %s825_s0 = inlined_call_operand.<no memory space> [shape: f32[1], index: 0, kind: input, shape index: {}]   ;;  %s826_s1 = inlined_call_operand.hbm [shape: bf16[24,32], index: 1, kind: input, shape index: {}]   ;;  %s827_s2 = inlined_call_operand.hbm [shape: bf16[24,32], index: 2, kind: input, shape index: {}]   ;;  %s828_s3 = inlined_call_operand.hbm [shape: f32[1,1], index: 3, kind: output, shape index: {}]  }
   0x1   :  { %8 = sst [smem:[#allocation6]] %s825_s0 }
   0x2   :  { %9 = vsyncpa [#allocation8], 0 }
   0x3   :  { %11 = vsyncpa [#allocation8 + $0x1], 0 }
   0x4   :  { %12 = vsyncpa [#allocation11], 0 }
   0x5   :  { %13 = vsyncpa [#allocation9], 0  ;;  %s697_s14 = smov 0   ;;  %s699_s15 = smov 0  }
   0x6   :  { %s701_s16 = smov 0   ;;  %s703_s17 = smov 0  }
   0x7 LB: > { %s127_s19 = sshll.u32 %s827_s2, 4  ;;  %s719_s20 = sadd.s32 4294967295, %s665_s17   ;;  %s665_s17 = sphi %s703_s17, %s835_s17   ;;  %s661_s16 = sphi %s701_s16, %s834_s16   ;;  %s657_s15 = sphi %s699_s15, %s833_s15   ;;  %s653_s14 = sphi %s697_s14, %s832_s14   ;;  %s128_s19 = int_to_ptr.hbm [resolvable:$true] %s127_s19 }
   0x8   : > { %p433_p0 = scmp.ge.s32.totalorder %s665_s17, 1  ;;  %p61_p1 = scmp.eq.s32.totalorder %s719_s20, 0 }
   0x9   : > { %p113_p2 = scmp.lt.s32.totalorder %s665_s17, 4  ;;  %p434_p3 = scmp.ne.s32.totalorder %s719_s20, 0 }
   0xa   : > { %s667_s22 = smov [#allocation10]   ;;  %s668_s24 = smov 64  }
   0xb   : > { %p725_p4 = pnand %p433_p0, %p113_p2  ;;  %s129_s23 = sshll.u32 %s667_s22, 4  ;;  %s130_s23 = int_to_ptr.vmem [resolvable:$true] %s129_s23 }
   0xc   : > { %s669_s25 = smov 4   ;;  %s734_s26 = sadd.s32 1, %s665_s17  }
   0xd   : > { %p471_p5 = pneg %p725_p4  ;;  %s44_s27 = ssub.s32 %s665_s17, %s734_s26 }
   0xe   : > { %s47_s28 = sadd.s32 1, %s661_s16  ;;  %p45_p7 = scmp.eq.s32.totalorder %s44_s27, 0 }
   0xf   : > { %p472_p6 = pnand %p471_p5, %p61_p1  ;;  %p54_p8 = scmp.ne.s32.totalorder %s661_s16, %s657_s15 }
  0x10   : > { %p55_p9 = scmp.eq.s32.totalorder %s665_s17, 0  ;;  %p60_p10 = scmp.ne.s32.totalorder %s657_s15, %s653_s14 }
  0x11   : > { %474 = dma.hbm_to_vmem [thread:$0]  (!%p472_p6), %s128_s19, 192, %s130_s23, [#allocation11], %s668_s24, %s668_s24, %s669_s25  }
  0x12   : > { %s744_s29 = scalar_select %p45_p7, %s661_s16, %s47_s28  }
  0x13   : > { %p56_p11 = por %p55_p9, %p54_p8  ;;  %p748_p12 = por %p61_p1, %p60_p10 }
  0x14   : > { %p480_p13 = scmp.lt.s32.totalorder %s665_s17, 3  ;;  %s143_s4 = sand.u32 1, %s661_s16  }
  0x15   : > { %s436_s5 = sshll.u32 %s143_s4, 2  ;;  %s437_s6 = sshll.u32 %s665_s17, 2 }
  0x16   : > { %s151_s9 = scalar_lea.hbm %s826_s1, %s437_s6  ;;  %s147_s10 = scalar_lea.vmem [#allocation7], %s436_s5 }
  0x17   : > { %s155_s11 = sshll.u32 %s147_s10, 4  ;;  %s153_s12 = sshll.u32 %s151_s9, 4  ;;  %s156_s11 = int_to_ptr.vmem [resolvable:$true] %s155_s11  ;;  %s154_s12 = int_to_ptr.hbm [resolvable:$true] %s153_s12 }
  0x18   : > { %p758_p0 = pnand %p480_p13, %p56_p11  ;;  %s144_s14 = scalar_lea.sflag [#allocation8], %s143_s4 }
  0x19   : > { %s565_s0 = sshra.s32 %s154_s12, 4  ;;  %s572_s22 = scalar_lea.hbm %s826_s1, 12  ;;  %s566_s0 = int_to_ptr.hbm [resolvable:$true] %s565_s0 }
  0x1a   : > { %s567_s18 = scalar_lea.hbm %s566_s0, 4  ;;  %p569_p5 = pneg %p758_p0 }
  0x1b   : > { %p568_p2 = scmp.ne.s32.totalorder %s566_s0, %s567_s18  ;;  %p573_p8 = scmp.lt.s32.totalorder %s566_s0, %s826_s1 }
  0x1c   : > { %p574_p9 = scmp.lt.s32.totalorder %s572_s22, %s567_s18 }
  0x1d   : > { %p570_p6 = pnand %p569_p5, %p568_p2 }
  0x1e   : > { %p575_p10 = por %p574_p9, %p573_p8 }
  0x1f   : > { %p571_p7 = pneg %p570_p6 }
  0x21   : > { %p576_p11 = pnand %p575_p10, %p571_p7 }
  0x23   : > { %579 = shalt.err (!%p576_p11)
}
  0x24   : > { %478 = dma.hbm_to_vmem [thread:$0]  (!%p758_p0), %s154_s12, 64, %s156_s11, %s144_s14  }
  0x25   : > { %164 = sbr.rel (%p725_p4) target bundleno = 859 (0x35b), region = 32  ;;  %s166_s25 = sand.u32 (!%p725_p4), 1, %s657_s15  }
  0x26   : > { %s439_s27 = sshll.u32 (!%p725_p4), %s166_s25, 2  ;;  %s167_s28 = scalar_lea.sflag (!%p725_p4), [#allocation8], %s166_s25 }
  0x27   : > { %s170_s4 = scalar_lea.vmem (!%p725_p4), [#allocation7], %s439_s27 }
  0x2a   : > { %640 = dma.done.wait (%p748_p12), %s167_s28, 64  }
  0x2b   : > { %642 = vsyncadd (%p748_p12), %s167_s28, 4294967232 }
  0x2c   : > { %644 = dma.done.wait (%p61_p1), [#allocation11], 192  }
  0x2d   : > { %646 = vsyncadd (%p61_p1), [#allocation11], 4294967104  ;;  %198 = sbr.rel (%p434_p3) target bundleno = 55 (0x37), region = 44 }
  0x32   : > { %vm199_vm0 = vcmask 188416   ;;  %vm202_vm1 = vcmask 0   ;;  %v670_v0 = vmov -inf   ;;  %v671_v1 = vmov 0.0  }
  0x33   : > { %200 = vst.msk [vmem:[#allocation2] sm:$0x1] %vm199_vm0, %v670_v0 }
  0x34   : > { %201 = vst.msk [vmem:[#allocation3] sm:$0x1] %vm199_vm0, %v671_v1 }
  0x35   : > { %203 = vst.msk [vmem:[#allocation4] sm:$0x1] %vm202_vm1, %v671_v1 }
  0x36   : > { %204 = vst.msk [vmem:[#allocation5] sm:$0x1] %vm202_vm1, %v671_v1 }
  0x37 PF: > { %v209_v2 = vld [vmem:[#allocation10 + $0x8] sm:$0xf]  ;;  %vm218_vm2 = vcmask 261120   ;;  %v454_v6 = vld [vmem:[#allocation10] sm:$0xff]  ;;  %v787_v8 = vld [vmem:[%s170_s4] sm:$0xf] }
  0x38   : > { %v215_v3 = vunpack.c.l.b16 %v209_v2  ;;  %v223_v7 = vsel %vm218_vm2, %v454_v6, 0  ;;  %s791_s21 = sld [smem:[#allocation6]]  ;;  %vm243_vm3 = vcmask 195584   ;;  %vm323_vm4 = vcmask 188416   ;;  %s447_s30 = sshll.u32 %s719_s20, 3 }
  0x39   : > { %s273_s5 = sshra.s32 %s447_s30, 3  ;;  %vm257_vm5 = vcmask 7168   ;;  %v279_v48 = vunpack.c.l.bf16 %v787_v8  ;;  %vm270_vm6 = vcmask 0   ;;  %p449_p1 = scmp.ne.s32.totalorder %s719_s20, 2 }
  0x3a   : > { %v217_v4 = vpack.c.b16 %v215_v3, %v215_v3  ;;  %v296_v19 = vld [vmem:[#allocation2] sm:$0x1]  ;;  %s448_s6 = sshll.u32 %s273_s5, 2 }
  0x3b   : > { %v313_v34 = vld [vmem:[#allocation3] sm:$0x1]  ;;  %s276_s7 = scalar_lea.vmem [#allocation10], %s448_s6 }
  0x3c   : > { %v226_v5 = vsel %vm218_vm2, %v217_v4, 0  ;;  %v277_v46 = vld [vmem:[%s276_s7] sm:$0xf] }
  0x3d   : > { %234 = vmatpush.bf16.xpose.msra.mxu0 %v226_v5  ;;  %v280_v50 = vunpack.c.l.bf16 %v277_v46  ;;  %v256_v4 = vld [vmem:[#allocation4] sm:$0x1] }
  0x3e   : > { %v241_v9 = vstv %s791_s21 }
  0x3f   : > { %v281_v52 = vmul.f32 %v280_v50, %v279_v48 }
  0x41   : > { %v282_v53 = vsel %vm218_vm2, %v281_v52, 0.0 }
  0x45   : > { %235 = vmatpush.bf16.xpose.msra.mxu0 %v223_v7  ;;  %v278_v7 = vld [vmem:[#allocation5] sm:$0x1] }
  0x4c   : > { %446 = vmatmul.msk.bf16.vlgmr.msra.gmra.mxu0 %vm218_vm2, %v787_v8 }
  0xc9   : > { %v237_v10 = vpop.f32.mrf.mxu0 }
  0xca   : > { %v242_v11 = vmul.f32 %v241_v9, %v237_v10 }
  0xcc   : > { %v244_v12 = vsel %vm243_vm3, %v242_v11, -inf }
  0xcd   : > { %245 = vmax.xlane.f32.xlu0 %v244_v12  ;;  %v297_v13 = vrot.slane %v244_v12, 4 }
  0xcf   : > { %v298_v14 = vmax.f32 %v244_v12, %v297_v13 }
  0xd1   : > { %v299_v15 = vrot.slane %v298_v14, 2  ;;  %v239_v16 = vpop.f32.mrf.mxu0 }
  0xd3   : > { %v300_v17 = vmax.f32 %v298_v14, %v299_v15 }
  0xd5   : > { %v301_v18 = vrot.slane %v300_v17, 1 }
  0xd7   : > { %v302_v20 = vmax.f32 %v300_v17, %v301_v18 }
  0xd9   : > { %v303_v21 = vmax.f32 %v296_v19, %v302_v20 }
  0xdb   : > { %v305_v22 = vperm.slane %v303_v21, 0  ;;  %325 = vst.msk [vmem:[#allocation2] sm:$0x1] %vm323_vm4, %v303_v21  ;;  %v310_v25 = vsub.f32 %v296_v19, %v303_v21 }
  0xdd   : > { %v307_v23 = vsub.f32 %v242_v11, %v305_v22  ;;  %v311_v26 = vmul.f32 1.442695, %v310_v25 }
  0xdf   : > { %v308_v24 = vmul.f32 1.442695, %v307_v23 }
  0xe1   : > { %523 = vpow2.f32 %v308_v24 }
  0xe2   : > { %525 = vpow2.f32 %v311_v26 }
  0xe7   : > { %v524_v27 = vpop.eup %523 }
  0xe8   : > { %v315_v28 = vsel %vm243_vm3, %v524_v27, 0.0  ;;  %v526_v33 = vpop.eup %525 }
  0xe9   : > { %v316_v29 = vrot.slane %v315_v28, 4  ;;  %v314_v36 = vmul.f32 %v526_v33, %v313_v34 }
  0xeb   : > { %v317_v30 = vadd.f32 %v316_v29, %v315_v28 }
  0xed   : > { %v318_v31 = vrot.slane %v317_v30, 2 }
  0xef   : > { %v319_v32 = vadd.f32 %v318_v31, %v317_v30 }
  0xf1   : > { %v320_v35 = vrot.slane %v319_v32, 1 }
  0xf3   : > { %v321_v37 = vadd.f32 %v320_v35, %v319_v32 }
  0xf5   : > { %v322_v38 = vadd.f32 %v321_v37, %v314_v36 }
  0xf7   : > { %324 = vst.msk [vmem:[#allocation3] sm:$0x1] %vm323_vm4, %v322_v38 }
 0x140   : > { %v246_v39 = vpop.xlane.xlu0 %245 }
 0x141   : > { %v247_v40 = vsub.f32 %v242_v11, %v246_v39 }
 0x143   : > { %v248_v41 = vmul.f32 1.442695, %v247_v40 }
 0x145   : > { %527 = vpow2.f32 %v248_v41 }
 0x14b   : > { %v528_v42 = vpop.eup %527 }
 0x14c   : > { %v250_v43 = vsel %vm243_vm3, %v528_v42, 0.0 }
 0x14d   : > { %251 = vadd.xlane.f32.xlu0 %v250_v43 }
 0x1c0   : > { %v252_v44 = vpop.xlane.xlu0 %251 }
 0x1c1   : > { %529 = vlog2.f32 %v252_v44 }
 0x1c7   : > { %v530_v45 = vpop.eup %529 }
 0x1c8   : > { %v254_v47 = vmul.f32 0.6931472, %v530_v45 }
 0x1ca   : > { %v255_v49 = vadd.f32 %v254_v47, %v246_v39 }
 0x1cc   : > { %v258_v51 = vsel %vm257_vm5, %v255_v49, 0.0 }
 0x1cd   : > { %259 = vadd.xlane.f32.xlu1 %v258_v51 }
 0x1d5   : > { %283 = vadd.xlane.f32.xlu1 %v282_v53 }
 0x240   : > { %v260_v54 = vpop.xlane.xlu1 %259 }
 0x241   : > { %v261_v55 = vrot.slane %v260_v54, 4 }
 0x243   : > { %v262_v56 = vadd.f32 %v261_v55, %v260_v54 }
 0x245   : > { %v263_v57 = vrot.slane %v262_v56, 2 }
 0x247   : > { %v264_v58 = vadd.f32 %v263_v57, %v262_v56 }
 0x248   : > { %v284_v59 = vpop.xlane.xlu1 %283 }
 0x249   : > { %v285_v60 = vrot.slane %v284_v59, 4  ;;  %v265_v61 = vrot.slane %v264_v58, 1 }
 0x24b   : > { %v286_v62 = vadd.f32 %v285_v60, %v284_v59  ;;  %v266_v63 = vadd.f32 %v265_v61, %v264_v58 }
 0x24d   : > { %v287_v0 = vrot.slane %v286_v62, 2  ;;  %455 = vpush %v266_v63 }
 0x24f   : > { %v288_v1 = vadd.f32 %v287_v0, %v286_v62 }
 0x251   : > { %v289_v2 = vrot.slane %v288_v1, 1 }
 0x253   : > { %v290_v3 = vadd.f32 %v289_v2, %v288_v1 }
 0x255   : > { %457 = vpush %v290_v3 }
 0x27e   : > { %s456_s8 = spop %455 }
 0x27f   : > { %v268_v5 = vstv %s456_s8 }
 0x280   : > { %v269_v6 = vadd.f32 %v268_v5, %v256_v4 }
 0x282   : > { %271 = vst.msk [vmem:[#allocation4] sm:$0x1] %vm270_vm6, %v269_v6 }
 0x286   : > { %s458_s9 = spop %457 }
 0x287   : > { %s292_s10 = smul.f32 %s458_s9, %s791_s21 }
 0x288   : > { %329 = sbr.rel (%p449_p1) target bundleno = 854 (0x356), region = 48 }
 0x289   : > { %v293_v8 = vstv %s292_s10 }
 0x28a   : > { %v294_v9 = vadd.f32 %v293_v8, %v278_v7 }
 0x28c   : > { %295 = vst.msk [vmem:[#allocation5] sm:$0x1] %vm270_vm6, %v294_v9 }
 0x28d   : > { %v331_v10 = vld [vmem:[#allocation3] sm:$0x1]  ;;  %v330_v12 = vld [vmem:[#allocation2] sm:$0x1]  ;;  %v672_v23 = vmov 24.0  }
 0x28e   : > { %531 = vlog2.f32 %v331_v10  ;;  %v345_v29 = vld [vmem:[#allocation4] sm:$0x1] }
 0x28f   : > { %533 = vrcp.f32 %v672_v23 }
 0x293   : > { %v348_v27 = vld [vmem:[#allocation5] sm:$0x1] }
 0x294   : > { %v532_v11 = vpop.eup %531  ;;  %v349_v30 = vmul.f32 2.0, %v348_v27 }
 0x295   : > { %v333_v13 = vmul.f32 0.6931472, %v532_v11  ;;  %v534_v24 = vpop.eup %533 }
 0x296   : > { %v353_v25 = vmul.f32 24.0, %v534_v24  ;;  %vm357_vm7 = vweird.f32 %v534_v24 }
 0x297   : > { %v334_v14 = vadd.f32 %v333_v13, %v330_v12 }
 0x298   : > { %v354_v26 = vsub.f32 1.0, %v353_v25 }
 0x299   : > { %v335_v15 = vsel %vm323_vm4, %v334_v14, 0.0 }
 0x29a   : > { %336 = vadd.xlane.f32.xlu0 %v335_v15  ;;  %v355_v28 = vmul.f32 %v534_v24, %v354_v26 }
 0x29c   : > { %v356_v32 = vadd.f32 %v534_v24, %v355_v28 }
 0x29e   : > { %v358_v35 = vsel %vm357_vm7, %v534_v24, %v356_v32 }
 0x30d   : > { %v337_v16 = vpop.xlane.xlu0 %336 }
 0x30e   : > { %v338_v17 = vrot.slane %v337_v16, 4 }
 0x310   : > { %v339_v18 = vadd.f32 %v338_v17, %v337_v16 }
 0x312   : > { %v340_v19 = vrot.slane %v339_v18, 2 }
 0x314   : > { %v341_v20 = vadd.f32 %v340_v19, %v339_v18 }
 0x316   : > { %v342_v21 = vrot.slane %v341_v20, 1 }
 0x318   : > { %v343_v22 = vadd.f32 %v342_v21, %v341_v20 }
 0x31a   : > { %459 = vpush %v343_v22 }
 0x34b   : > { %s460_s11 = spop %459 }
 0x34c   : > { %v346_v31 = vstv %s460_s11 }
 0x34d   : > { %v347_v33 = vadd.f32 %v346_v31, %v345_v29 }
 0x34f   : > { %v350_v34 = vsub.f32 %v347_v33, %v349_v30 }
 0x351   : > { %v351_v36 = vmul.f32 0.5, %v350_v34 }
 0x353   : > { %v359_v37 = vmul.f32 %v358_v35, %v351_v36 }
 0x355   : > { %360 = vst.msk [vmem:[#allocation12] sm:$0x1] %vm270_vm6, %v359_v37 }
 0x356 PF: > { %p482_p3 = scmp.eq.s32.totalorder %s719_s20, 2  ;;  %s673_s12 = smov [#allocation12]  }
 0x357   : > { %s367_s13 = sshll.u32 %s673_s12, 4  ;;  %s369_s18 = sshll.u32 %s828_s3, 4  ;;  %s368_s13 = int_to_ptr.vmem [resolvable:$true] %s367_s13  ;;  %s370_s18 = int_to_ptr.hbm [resolvable:$true] %s369_s18 }
 0x358   : > { %468 = dma.vmem_to_hbm [thread:$0]  (%p482_p3), %s368_s13, 16, %s370_s18, [#allocation9]  }
 0x359   : > { %648 = dma.done.wait (%p482_p3), [#allocation9], 16  }
 0x35a   : > { %650 = vsyncadd (%p482_p3), [#allocation9], 4294967280 }
 0x35b PF: > { %p16_p4 = scmp.ge.s32.totalorder %s734_s26, 5   ;;  %s832_s14 = smov %s657_s15 }
 0x35c   : > { %s833_s15 = smov %s661_s16  ;;  %s834_s16 = smov %s744_s29 }
 0x35d   : > { %s835_s17 = smov %s734_s26  ;;  %18 = sbr.rel (!%p16_p4) target bundleno = 7 (0x7), region = 82 }
 0x362   :  { %383 = vsyncpa [#allocation8], 1 }
 0x363   :  { %385 = vsyncpa [#allocation8 + $0x1], 1 }
 0x364   :  { %386 = vsyncpa [#allocation11], 1 }
 0x365   :  { %387 = vsyncpa [#allocation9], 1 }
 0x366   :  { %389 = vsyncpa [#allocation9 + $0x1], 1 }

</bundles_post_ra>
